<compile_context>
chip_gen: v5e
topology: v5e:2x2
jax: 0.10.0
libtpu: 0.0.40
codegen_flags: <defaults>
</compile_context>

<pallas_src>
from functools import partial

import numpy as np
import jax
import jax.numpy as jnp
from jax.experimental import pallas as pl
from jax.experimental.pallas import tpu as pltpu

LANE = 128  # TPU lane width: hidden feature dims are padded to a multiple of this.


def _round_up(n, m):
    return ((n + m - 1) // m) * m


# ----------------------------- Pallas kernel --------------------------------
def actor_kernel(x_ref, w1_ref, b1_ref, w2_ref, b2_ref, wh_ref, bh_ref,
                 logits_ref):
    # Hidden layer 1: tanh(x @ W1 + b1)   (MXU matmul, f32 accumulate, EUP tanh)
    h = jnp.tanh(
        jnp.dot(x_ref[...], w1_ref[...], preferred_element_type=jnp.float32)
        + b1_ref[...]
    )
    # Hidden layer 2: tanh(h @ W2 + b2)   (cast back to weight dtype for the MXU)
    h = jnp.tanh(
        jnp.dot(h.astype(w2_ref.dtype), w2_ref[...],
                preferred_element_type=jnp.float32)
        + b2_ref[...]
    )
    # Categorical action head: logits = h @ Wh + bh  (only real lanes stored)
    logits_ref[...] = (
        jnp.dot(h.astype(wh_ref.dtype), wh_ref[...],
                preferred_element_type=jnp.float32)
        + bh_ref[...]
    ).astype(logits_ref.dtype)


# ------------------------------- wrapper -------------------------------------
@partial(jax.jit, static_argnums=(2,), static_argnames=("block_b",))
def actor_forward(x, padded_params, n_actions, *, block_b=1024):
    """Run the Actor forward pass; returns Categorical logits [B, n_actions]."""
    w1, b1, w2, b2, wh, bh = padded_params
    B, obs = x.shape
    assert obs == w1.shape[0], "x feature dim must match W1 input dim (unpadded)"
    A = wh.shape[1]
    assert A == n_actions

    # Match the weight I/O dtype (f32 by default, bf16 for the low-DMA path).
    x = x.astype(w1.dtype)

    # Batch tiling: TB is a multiple of 8 (sublane).
    block_b = max(8, _round_up(block_b, 8))
    tb_full = _round_up(B, 8)
    TB = min(block_b, tb_full)
    # Prefer >= 2 grid steps when the batch is big enough so both of v7x's
    # TensorCores get work; harmless on v5e/v6e.
    if TB > 8 and TB == tb_full:
        TB = max(8, _round_up((B + 1) // 2, 8))
    Bp = _round_up(B, TB)
    if Bp > B:
        x = jnp.pad(x, ((0, Bp - B), (0, 0)))   # single pad, batch dim only

    grid = (Bp // TB,)

    def const_spec(arr):
        # Weights / biases: whole array, same block every step -> DMA'd once,
        # VMEM-resident across the grid.
        return pl.BlockSpec(arr.shape, lambda i: (0, 0))

    out = pl.pallas_call(
        actor_kernel,
        out_shape=jax.ShapeDtypeStruct((Bp, A), jnp.float32),
        grid=grid,
        in_specs=[
            pl.BlockSpec((TB, obs), lambda i: (i, 0)),   # x: batch-tiled, obs unpadded
            const_spec(w1), const_spec(b1),
            const_spec(w2), const_spec(b2),
            const_spec(wh), const_spec(bh),
        ],
        out_specs=pl.BlockSpec((TB, A), lambda i: (i, 0)),  # only real logits written
        compiler_params=pltpu.CompilerParams(
            dimension_semantics=("parallel",),   # batch tiles independent
        ),
    )(x, w1, b1, w2, b2, wh, bh)

    return out[:B] if Bp > B else out


# --------------------------- deterministic init ------------------------------
def _orthogonal(rng, shape, gain):
    """Orthogonal init (matches torch.nn.init.orthogonal_ semantics)."""
    rows, cols = shape
    flat = rng.standard_normal((max(rows, cols), min(rows, cols)))
    q, r = np.linalg.qr(flat)
    q = q * np.sign(np.diag(r))  # deterministic sign convention
    if rows < cols:
        q = q.T
    return (gain * q[:rows, :cols]).astype(np.float32)


def make_actor_params(obs_dim, sizes, n_actions, seed=0):
    """Logical (unpadded) parameters, stored as [in, out] / [1, out]."""
    rng = np.random.default_rng(seed)
    tanh_gain = 5.0 / 3.0          # nn.init.calculate_gain('tanh')
    head_gain = 0.01               # typical CategoricalHead ortho_init gain
    dims = [obs_dim] + list(sizes)
    params = []
    for d_in, d_out in zip(dims[:-1], dims[1:]):
        w_t = _orthogonal(rng, (d_out, d_in), tanh_gain)       # torch [out, in]
        params.append(jnp.asarray(w_t.T))                      # -> [in, out]
        params.append(jnp.zeros((1, d_out), jnp.float32))      # constant_bias=0
    wh_t = _orthogonal(rng, (n_actions, dims[-1]), head_gain)
    params.append(jnp.asarray(wh_t.T))
    params.append(jnp.zeros((1, n_actions), jnp.float32))
    return tuple(params)


def pad_params(params, pad_to=LANE, weight_dtype=jnp.float32):
    """Pad only the *internal* hidden dims to lane multiples.

    - W1: input dim (obs) kept UNPADDED, output dim padded.
    - W2: both dims padded (hidden -> hidden).
    - Wh: input dim padded, output dim (n_actions) kept UNPADDED.
    Biases stay float32 (added after the f32 accumulation).
    """
    w1, b1, w2, b2, wh, bh = params

    def pad_out(a):
        po = _round_up(a.shape[1], pad_to) - a.shape[1]
        return jnp.pad(a, ((0, 0), (0, po)))

    def pad_both(w):
        pi = _round_up(w.shape[0], pad_to) - w.shape[0]
        po = _round_up(w.shape[1], pad_to) - w.shape[1]
        return jnp.pad(w, ((0, pi), (0, po)))

    def pad_in(w):
        pi = _round_up(w.shape[0], pad_to) - w.shape[0]
        return jnp.pad(w, ((0, pi), (0, 0)))

    return (
        pad_out(w1).astype(weight_dtype),   # [obs,   H1p]
        pad_out(b1),                        # [1,     H1p]  (f32)
        pad_both(w2).astype(weight_dtype),  # [H1p,   H2p]
        pad_out(b2),                        # [1,     H2p]  (f32)
        pad_in(wh).astype(weight_dtype),    # [H2p,   n_actions]
        bh,                                 # [1,     n_actions]  (f32)
    )


# ------------------------------ pure-JAX ref ---------------------------------
def actor_ref(x, params):
    w1, b1, w2, b2, wh, bh = params
    h = jnp.tanh(x @ w1 + b1)
    h = jnp.tanh(h @ w2 + b2)
    return h @ wh + bh


# ---------------------------------- main -------------------------------------
if __name__ == "__main__":
    # Small shapes consistent with the module: obs_dim=16, nn.sizes=[32, 32],
    # Discrete action space with n=6, batch=8.
    B, OBS, SIZES, NACT = 8, 16, (32, 32), 6

    key = jax.random.PRNGKey(0)
    x = jax.random.normal(key, (B, OBS), dtype=jnp.float32)

    params = make_actor_params(OBS, SIZES, NACT, seed=0)
    padded = pad_params(params)                       # f32 I/O path

    # Single-tile path (B=8 -> one grid step), exact vs f32 reference.
    logits = jax.block_until_ready(actor_forward(x, padded, NACT))
    ref = actor_ref(x, params)
    np.testing.assert_allclose(np.asarray(logits), np.asarray(ref),
                               rtol=1e-5, atol=1e-5)

    # Multi-tile path: exercise the batch grid + batch padding (grid=(3,)).
    x2 = jax.random.normal(jax.random.PRNGKey(1), (40, OBS), dtype=jnp.float32)
    logits2 = jax.block_until_ready(actor_forward(x2, padded, NACT, block_b=16))
    ref2 = actor_ref(x2, params)
    np.testing.assert_allclose(np.asarray(logits2), np.asarray(ref2),
                               rtol=1e-5, atol=1e-5)

    # bf16 DMA path (weights + x in bf16, f32 accumulation/tanh) — looser
    # tolerance vs the f32 reference by design (bf16 has ~8 mantissa bits).
    padded_bf16 = pad_params(params, weight_dtype=jnp.bfloat16)
    logits3 = jax.block_until_ready(actor_forward(x2, padded_bf16, NACT))
    np.testing.assert_allclose(np.asarray(logits3), np.asarray(ref2),
                               rtol=1e-1, atol=5e-3)

    # TODO(synk): torch.distributions.Categorical itself (sampling / log_prob /
    # entropy helpers) has no Pallas equivalent; the kernel returns its logits.
    print("KERNEL_OK")
</pallas_src>

<mosaic_0001>
module attributes {stable_mosaic.version = 11 : i64} {
  func.func @actor_kernel(%arg0: i32, %arg1: memref<8x16xf32, #tpu.memory_space<vmem>>, %arg2: memref<16x128xf32, #tpu.memory_space<vmem>>, %arg3: memref<1x128xf32, #tpu.memory_space<vmem>>, %arg4: memref<128x128xf32, #tpu.memory_space<vmem>>, %arg5: memref<1x128xf32, #tpu.memory_space<vmem>>, %arg6: memref<128x6xf32, #tpu.memory_space<vmem>>, %arg7: memref<1x6xf32, #tpu.memory_space<vmem>>, %arg8: memref<8x6xf32, #tpu.memory_space<vmem>>) attributes {dimension_semantics = [#tpu.dimension_semantics<parallel>], iteration_bounds = array<i64: 1>, scalar_prefetch = 0 : i64, scratch_operands = 0 : i64, tpu.core_type = #tpu.core_type<tc>, window_params = [{transform_indices = @transform_0, window_bounds = array<i64: 8, 16>}, {pipeline_mode = #tpu.pipeline_mode<synchronous>, transform_indices = @transform_1, window_bounds = array<i64: 16, 128>}, {pipeline_mode = #tpu.pipeline_mode<synchronous>, transform_indices = @transform_2, window_bounds = array<i64: 1, 128>}, {pipeline_mode = #tpu.pipeline_mode<synchronous>, transform_indices = @transform_3, window_bounds = array<i64: 128, 128>}, {pipeline_mode = #tpu.pipeline_mode<synchronous>, transform_indices = @transform_4, window_bounds = array<i64: 1, 128>}, {pipeline_mode = #tpu.pipeline_mode<synchronous>, transform_indices = @transform_5, window_bounds = array<i64: 128, 6>}, {pipeline_mode = #tpu.pipeline_mode<synchronous>, transform_indices = @transform_6, window_bounds = array<i64: 1, 6>}, {transform_indices = @transform_7, window_bounds = array<i64: 8, 6>}]} {
    %c0 = arith.constant 0 : index
    %c0_0 = arith.constant 0 : index
    %0 = vector.load %arg1[%c0, %c0_0] : memref<8x16xf32, #tpu.memory_space<vmem>>, vector<8x16xf32>
    %c0_1 = arith.constant 0 : index
    %c0_2 = arith.constant 0 : index
    %1 = vector.load %arg2[%c0_1, %c0_2] : memref<16x128xf32, #tpu.memory_space<vmem>>, vector<16x128xf32>
    %cst = arith.constant dense<0.000000e+00> : vector<8x128xf32>
    %2 = tpu.matmul %0, %1, %cst {dimension_numbers = #tpu.dot_dimension_numbers<[1], [0], [0], [1], [0, 0, 1, 1], [], []>} : vector<8x16xf32>, vector<16x128xf32>, vector<8x128xf32> -> vector<8x128xf32>
    %c0_3 = arith.constant 0 : index
    %c0_4 = arith.constant 0 : index
    %3 = vector.load %arg3[%c0_3, %c0_4] : memref<1x128xf32, #tpu.memory_space<vmem>>, vector<1x128xf32>
    %4 = vector.broadcast %3 : vector<1x128xf32> to vector<8x128xf32>
    %5 = arith.addf %2, %4 : vector<8x128xf32>
    %6 = math.tanh %5 : vector<8x128xf32>
    %c0_5 = arith.constant 0 : index
    %c0_6 = arith.constant 0 : index
    %7 = vector.load %arg4[%c0_5, %c0_6] : memref<128x128xf32, #tpu.memory_space<vmem>>, vector<128x128xf32>
    %cst_7 = arith.constant dense<0.000000e+00> : vector<8x128xf32>
    %8 = tpu.matmul %6, %7, %cst_7 {dimension_numbers = #tpu.dot_dimension_numbers<[1], [0], [0], [1], [0, 0, 1, 1], [], []>} : vector<8x128xf32>, vector<128x128xf32>, vector<8x128xf32> -> vector<8x128xf32>
    %c0_8 = arith.constant 0 : index
    %c0_9 = arith.constant 0 : index
    %9 = vector.load %arg5[%c0_8, %c0_9] : memref<1x128xf32, #tpu.memory_space<vmem>>, vector<1x128xf32>
    %10 = vector.broadcast %9 : vector<1x128xf32> to vector<8x128xf32>
    %11 = arith.addf %8, %10 : vector<8x128xf32>
    %12 = math.tanh %11 : vector<8x128xf32>
    %c0_10 = arith.constant 0 : index
    %c0_11 = arith.constant 0 : index
    %13 = vector.load %arg6[%c0_10, %c0_11] : memref<128x6xf32, #tpu.memory_space<vmem>>, vector<128x6xf32>
    %cst_12 = arith.constant dense<0.000000e+00> : vector<8x6xf32>
    %14 = tpu.matmul %12, %13, %cst_12 {dimension_numbers = #tpu.dot_dimension_numbers<[1], [0], [0], [1], [0, 0, 1, 1], [], []>} : vector<8x128xf32>, vector<128x6xf32>, vector<8x6xf32> -> vector<8x6xf32>
    %c0_13 = arith.constant 0 : index
    %c0_14 = arith.constant 0 : index
    %15 = vector.load %arg7[%c0_13, %c0_14] : memref<1x6xf32, #tpu.memory_space<vmem>>, vector<1x6xf32>
    %16 = vector.broadcast %15 : vector<1x6xf32> to vector<8x6xf32>
    %17 = arith.addf %14, %16 : vector<8x6xf32>
    %c0_15 = arith.constant 0 : index
    %c0_16 = arith.constant 0 : index
    %18 = vector.load %arg8[%c0_15, %c0_16] : memref<8x6xf32, #tpu.memory_space<vmem>>, vector<8x6xf32>
    tpu.vector_store %arg8[%c0_15, %c0_16], %17 {strides = array<i32>} : memref<8x6xf32, #tpu.memory_space<vmem>>, vector<8x6xf32>,
    return
  }
  func.func @transform_0(%arg0: i32) -> (i32, i32) {
    %c0_i32 = arith.constant 0 : i32
    %c0_i32_0 = arith.constant 0 : i32
    return %arg0, %c0_i32 : i32, i32
  }
  func.func @transform_1(%arg0: i32) -> (i32, i32) {
    %c0_i32 = arith.constant 0 : i32
    %c0_i32_0 = arith.constant 0 : i32
    %c0_i32_1 = arith.constant 0 : i32
    return %c0_i32, %c0_i32_0 : i32, i32
  }
  func.func @transform_2(%arg0: i32) -> (i32, i32) {
    %c0_i32 = arith.constant 0 : i32
    %c0_i32_0 = arith.constant 0 : i32
    %c0_i32_1 = arith.constant 0 : i32
    return %c0_i32, %c0_i32_0 : i32, i32
  }
  func.func @transform_3(%arg0: i32) -> (i32, i32) {
    %c0_i32 = arith.constant 0 : i32
    %c0_i32_0 = arith.constant 0 : i32
    %c0_i32_1 = arith.constant 0 : i32
    return %c0_i32, %c0_i32_0 : i32, i32
  }
  func.func @transform_4(%arg0: i32) -> (i32, i32) {
    %c0_i32 = arith.constant 0 : i32
    %c0_i32_0 = arith.constant 0 : i32
    %c0_i32_1 = arith.constant 0 : i32
    return %c0_i32, %c0_i32_0 : i32, i32
  }
  func.func @transform_5(%arg0: i32) -> (i32, i32) {
    %c0_i32 = arith.constant 0 : i32
    %c0_i32_0 = arith.constant 0 : i32
    %c0_i32_1 = arith.constant 0 : i32
    return %c0_i32, %c0_i32_0 : i32, i32
  }
  func.func @transform_6(%arg0: i32) -> (i32, i32) {
    %c0_i32 = arith.constant 0 : i32
    %c0_i32_0 = arith.constant 0 : i32
    %c0_i32_1 = arith.constant 0 : i32
    return %c0_i32, %c0_i32_0 : i32, i32
  }
  func.func @transform_7(%arg0: i32) -> (i32, i32) {
    %c0_i32 = arith.constant 0 : i32
    %c0_i32_0 = arith.constant 0 : i32
    return %arg0, %c0_i32 : i32, i32
  }
}

</mosaic_0001>

<bundles_post_ra>
// kernel: actor_forward.1
= control target key start
LH: loop header
LB: loop body
LE: loop exit
PB: predicated region body
PF: predicated region fallthrough
CT: control target
= control target key end

     0   :  { %12 = vsyncpa [#allocation3], 0  ;;  %s397_s0 = inlined_call_operand.vmem [shape: f32[8,16], index: 0, kind: input, shape index: {}]   ;;  %s398_s1 = inlined_call_operand.hbm [shape: f32[16,128], index: 1, kind: input, shape index: {}]   ;;  %s399_s2 = inlined_call_operand.vmem [shape: f32[1,128], index: 2, kind: input, shape index: {}]   ;;  %s400_s3 = inlined_call_operand.vmem [shape: f32[128,128], index: 3, kind: input, shape index: {}]   ;;  %s401_s4 = inlined_call_operand.vmem [shape: f32[1,128], index: 4, kind: input, shape index: {}]   ;;  %s402_s5 = inlined_call_operand.vmem [shape: f32[128,6], index: 5, kind: input, shape index: {}]   ;;  %s403_s6 = inlined_call_operand.vmem [shape: f32[1,6], index: 6, kind: input, shape index: {}]   ;;  %s404_s7 = inlined_call_operand.hbm [shape: f32[8,6], index: 7, kind: output, shape index: {}]  }
   0x1   :  { %13 = vsyncpa [#allocation4], 0  ;;  %s20_s26 = sshll.u32 %s398_s1, 4  ;;  %s239_s27 = smov [#allocation2]   ;;  %s21_s26 = int_to_ptr.hbm [resolvable:$true] %s20_s26 }
   0x2   :  { %s22_s28 = sshll.u32 %s239_s27, 4  ;;  %s240_s29 = smov 128   ;;  %s23_s28 = int_to_ptr.vmem [resolvable:$true] %s22_s28 }
   0x3   :  { %s241_s30 = smov 8  }
   0x4   :  { %28 = dma.hbm_to_vmem [thread:$0]  %s21_s26, 256, %s23_s28, [#allocation3], %s240_s29, %s240_s29, %s241_s30  }
   0x5   :  { %235 = dma.done.wait [#allocation3], 256  }
   0x6   :  { %236 = vsyncadd [#allocation3], 4294967040  ;;  %v45_v0 = vld [vmem:[#allocation2 + $0x8] sm:$0xff]  ;;  %v44_v1 = vld [vmem:[#allocation2] sm:$0xff]  ;;  %vm50_vm0 = vcmask 130048   ;;  %s242_s25 = smov [#allocation5]  }
   0x7   :  { %68 = vmatpush.msra.mxu0 %v45_v0  ;;  %v43_v2 = vld [vmem:[%s397_s0] sm:$0xff]  ;;  %v90_v3 = vld [vmem:[%s400_s3 + $0x78] sm:$0xff]  ;;  %v89_v4 = vld [vmem:[%s400_s3 + $0x70] sm:$0xff]  ;;  %s163_s26 = sshll.u32 %s242_s25, 4  ;;  %vm156_vm1 = vcmask 48128   ;;  %s164_s26 = int_to_ptr.vmem [resolvable:$true] %s163_s26 }
   0x8   :  { %95 = vmatpush.msra.mxu1 %v90_v3  ;;  %v88_v5 = vld [vmem:[%s400_s3 + $0x68] sm:$0xff]  ;;  %v87_v6 = vld [vmem:[%s400_s3 + $0x60] sm:$0xff]  ;;  %v86_v7 = vld [vmem:[%s400_s3 + $0x58] sm:$0xff] }
   0x9   :  { %69 = vmatpush.msra.mxu0 %v44_v1  ;;  %v85_v8 = vld [vmem:[%s400_s3 + $0x50] sm:$0xff]  ;;  %v84_v9 = vld [vmem:[%s400_s3 + $0x48] sm:$0xff]  ;;  %v83_v10 = vld [vmem:[%s400_s3 + $0x40] sm:$0xff] }
   0xa   :  { %175 = vmatmul.msk.f32.vlgmr.msra.gmra.mxu0 %vm50_vm0, %v43_v2  ;;  %96 = vmatpush.msra.mxu1 %v89_v4  ;;  %v82_v11 = vld [vmem:[%s400_s3 + $0x38] sm:$0xff]  ;;  %v81_v12 = vld [vmem:[%s400_s3 + $0x30] sm:$0xff]  ;;  %v80_v13 = vld [vmem:[%s400_s3 + $0x28] sm:$0xff] }
   0xb   :  { %v79_v14 = vld [vmem:[%s400_s3 + $0x20] sm:$0xff]  ;;  %v78_v15 = vld [vmem:[%s400_s3 + $0x18] sm:$0xff]  ;;  %v77_v16 = vld [vmem:[%s400_s3 + $0x10] sm:$0xff] }
   0xc   :  { %97 = vmatpush.msra.mxu1 %v88_v5  ;;  %v76_v17 = vld [vmem:[%s400_s3 + $0x8] sm:$0xff]  ;;  %v75_v18 = vld [vmem:[%s400_s3] sm:$0xff]  ;;  %v131_v19 = vld [vmem:[%s402_s5 + $0x78] sm:$0xff] }
   0xd   :  { %v130_v20 = vld [vmem:[%s402_s5 + $0x70] sm:$0xff]  ;;  %136 = vmatpush.msra.mxu2 %v131_v19  ;;  %v129_v21 = vld [vmem:[%s402_s5 + $0x68] sm:$0xff]  ;;  %v128_v22 = vld [vmem:[%s402_s5 + $0x60] sm:$0xff] }
   0xe   :  { %98 = vmatpush.msra.mxu1 %v87_v6  ;;  %v127_v23 = vld [vmem:[%s402_s5 + $0x58] sm:$0xff]  ;;  %v126_v24 = vld [vmem:[%s402_s5 + $0x50] sm:$0xff]  ;;  %v125_v25 = vld [vmem:[%s402_s5 + $0x48] sm:$0xff] }
   0xf   :  { %137 = vmatpush.msra.mxu2 %v130_v20  ;;  %v124_v26 = vld [vmem:[%s402_s5 + $0x40] sm:$0xff]  ;;  %v123_v27 = vld [vmem:[%s402_s5 + $0x38] sm:$0xff]  ;;  %v122_v28 = vld [vmem:[%s402_s5 + $0x30] sm:$0xff] }
  0x10   :  { %99 = vmatpush.msra.mxu1 %v86_v7  ;;  %v121_v29 = vld [vmem:[%s402_s5 + $0x28] sm:$0xff]  ;;  %v180_v30 = vld [vmem:[%s399_s2] ss:$0 sm:$0xff]  ;;  %v119_v35 = vld [vmem:[%s402_s5 + $0x18] sm:$0xff] }
  0x11   :  { %138 = vmatpush.msra.mxu2 %v129_v21  ;;  %v120_v34 = vld [vmem:[%s402_s5 + $0x20] sm:$0xff]  ;;  %v118_v36 = vld [vmem:[%s402_s5 + $0x10] sm:$0xff]  ;;  %v117_v37 = vld [vmem:[%s402_s5 + $0x8] sm:$0xff] }
  0x12   :  { %100 = vmatpush.msra.mxu1 %v85_v8  ;;  %v116_v38 = vld [vmem:[%s402_s5] sm:$0xff]  ;;  %s165_s5 = sshll.u32 %s404_s7, 4  ;;  %s166_s5 = int_to_ptr.hbm [resolvable:$true] %s165_s5 }
  0x13   :  { %139 = vmatpush.msra.mxu2 %v128_v22  ;;  %v181_v39 = vld [vmem:[%s401_s4] ss:$0 sm:$0xff] }
  0x14   :  { %101 = vmatpush.msra.mxu1 %v84_v9  ;;  %v182_v43 = vld [vmem:[%s403_s6] ss:$0 sm:$0xff] }
  0x15   :  { %140 = vmatpush.msra.mxu2 %v127_v23 }
  0x16   :  { %102 = vmatpush.msra.mxu1 %v83_v10 }
  0x17   :  { %141 = vmatpush.msra.mxu2 %v126_v24 }
  0x18   :  { %103 = vmatpush.msra.mxu1 %v82_v11 }
  0x19   :  { %142 = vmatpush.msra.mxu2 %v125_v25 }
  0x1a   :  { %104 = vmatpush.msra.mxu1 %v81_v12 }
  0x1b   :  { %143 = vmatpush.msra.mxu2 %v124_v26 }
  0x1c   :  { %105 = vmatpush.msra.mxu1 %v80_v13 }
  0x1d   :  { %144 = vmatpush.msra.mxu2 %v123_v27 }
  0x1e   :  { %106 = vmatpush.msra.mxu1 %v79_v14 }
  0x1f   :  { %145 = vmatpush.msra.mxu2 %v122_v28 }
  0x20   :  { %107 = vmatpush.msra.mxu1 %v78_v15 }
  0x21   :  { %146 = vmatpush.msra.mxu2 %v121_v29 }
  0x22   :  { %108 = vmatpush.msra.mxu1 %v77_v16 }
  0x23   :  { %147 = vmatpush.msra.mxu2 %v120_v34 }
  0x24   :  { %109 = vmatpush.msra.mxu1 %v76_v17 }
  0x25   :  { %148 = vmatpush.msra.mxu2 %v119_v35 }
  0x26   :  { %110 = vmatpush.msra.mxu1 %v75_v18 }
  0x27   :  { %149 = vmatpush.msra.mxu2 %v118_v36 }
  0x29   :  { %150 = vmatpush.msra.mxu2 %v117_v37 }
  0x2b   :  { %151 = vmatpush.msra.mxu2 %v116_v38 }
  0x87   :  { %v71_v31 = vpop.f32.mrf.mxu0 }
  0x88   :  { %v72_v32 = vadd.f32 %v180_v30, %v71_v31 }
  0x8a   :  { %183 = vtanh.f32 %v72_v32 }
  0x90   :  { %v184_v33 = vpop.eup %183 }
  0x91   :  { %111 = vmatmul.f32.vlgmr.msra.gmra.mxu1 %v184_v33 }
 0x10e   :  { %v112_v40 = vpop.f32.mrf.mxu1 }
 0x10f   :  { %v113_v41 = vadd.f32 %v181_v39, %v112_v40 }
 0x111   :  { %185 = vtanh.f32 %v113_v41 }
 0x117   :  { %v186_v42 = vpop.eup %185 }
 0x118   :  { %152 = vmatmul.f32.vlgmr.msra.gmra.mxu2 %v186_v42 }
 0x19b   :  { %v153_v44 = vpop.f32.mrf.mxu2 }
 0x19c   :  { %v154_v45 = vadd.f32 %v182_v43, %v153_v44 }
 0x19e   :  { %157 = vst.msk [vmem:[#allocation5] sm:$0xff] %vm156_vm1, %v154_v45 }
 0x19f   :  { %168 = dma.vmem_to_hbm [thread:$0]  %s164_s26, 128, %s166_s5, [#allocation4]  }
 0x1a0   :  { %237 = dma.done.wait [#allocation4], 128  }
 0x1a1   :  { %238 = vsyncadd [#allocation4], 4294967168 }
 0x1a2   :  { %173 = vsyncpa [#allocation3], 1 }
 0x1a3   :  { %174 = vsyncpa [#allocation4], 1 }

</bundles_post_ra>
